<compile_context>
chip_gen: v5e
topology: v5e:2x2
jax: 0.10.0
libtpu: 0.0.40
codegen_flags: <defaults>
</compile_context>

<pallas_src>
import jax
import jax.numpy as jnp
from jax.experimental import pallas as pl
from jax.experimental.pallas import tpu as pltpu


# ----------------------------- Pallas kernel --------------------------------
def attflat_kernel(x_ref, bias_ref, fcw_ref, fcb_ref, lw_ref, lb_ref,
                   mw_ref, mb_ref, out_ref):
    # x_ref:    (TB, S, Hw)   slimmed input batch-tile
    # bias_ref: (TB, S)       additive mask bias (0 = valid, -1e9 = masked), f32
    # fcw_ref:  (Hw, Mw)      fc weight     (sliced 'mid' + transposed)
    # fcb_ref:  (1, Mw)
    # lw_ref:   (Mw, G)       glimpse weight (sliced 'end' + transposed)
    # lb_ref:   (G, 1)
    # mw_ref:   (G*Hw, Ow)    merge weight  (sliced 'mid' + transposed)
    # mb_ref:   (1, Ow)
    # out_ref:  (TB, Ow)
    tb, _, hw = x_ref.shape
    g = lw_ref.shape[1]

    x = x_ref[...]                                              # (TB, S, Hw)

    # fc: Linear + ReLU.  (Dropout is an inference no-op.)
    # TODO(synk): training-mode dropout (DROPOUT_R > 0) not implemented.
    h = jnp.einsum("bsh,hm->bsm", x, fcw_ref[...],
                   preferred_element_type=jnp.float32)
    h = jnp.maximum(h + fcb_ref[...][None, :, :], 0.0)          # (TB, S, Mw) f32

    # Glimpse-attention logits, lane-dense layout: S on lanes -> (TB, G, S).
    logits = jnp.einsum("bsm,mg->bgs", h.astype(lw_ref.dtype), lw_ref[...],
                        preferred_element_type=jnp.float32)
    logits = logits + lb_ref[...][None, :, :]                   # (1, G, 1)
    logits = logits + bias_ref[...][:, None, :]                 # additive mask

    # Masked softmax over the sequence axis (lane reduce).
    m = jnp.max(logits, axis=-1, keepdims=True)
    e = jnp.exp(logits - m)
    denom = jnp.sum(e, axis=-1, keepdims=True)
    att = e * pl.reciprocal(denom, approx=True)                 # (TB, G, S) f32

    # Per-glimpse weighted sums of x + merge Linear, all on the MXU.
    wg = jnp.einsum("bgs,bsh->bgh", att.astype(x.dtype), x,
                    preferred_element_type=jnp.float32)         # (TB, G, Hw)
    wg = wg.reshape(tb, g * hw)                    # == torch.cat(att_list, 1)
    out = jnp.dot(wg.astype(mw_ref.dtype), mw_ref[...],
                  preferred_element_type=jnp.float32) + mb_ref[...]
    out_ref[...] = out.astype(out_ref.dtype)


# --------------------------- wrapper / glue ----------------------------------
def prepare_slim_params(params, width, C, matmul_dtype=jnp.float32):
    """Slice the full weights (slimmable styles 'mid'/'end'/'mid') and transpose
    once per width.  Cache the result per width; do NOT redo this every step."""
    hid_w = int(C["HIDDEN_SIZE"] * width)
    mlp_w = int(C["FLAT_MLP_SIZE"] * width)
    out_w = int(C["FLAT_OUT_SIZE"] * width)
    merge_in_w = int(C["HIDDEN_SIZE"] * C["FLAT_GLIMPSES"] * width)
    G = C["FLAT_GLIMPSES"]
    assert merge_in_w == G * hid_w
    return dict(
        fc_w=params["fc_w"][:mlp_w, :hid_w].T.astype(matmul_dtype),         # (Hw, Mw)
        fc_b=params["fc_b"][:mlp_w][None, :].astype(jnp.float32),           # (1, Mw)
        lin_w=params["lin_w"][:, :mlp_w].T.astype(matmul_dtype),            # (Mw, G)
        lin_b=params["lin_b"][:, None].astype(jnp.float32),                 # (G, 1)
        mrg_w=params["mrg_w"][:out_w, :merge_in_w].T.astype(matmul_dtype),  # (G*Hw, Ow)
        mrg_b=params["mrg_b"][:out_w][None, :].astype(jnp.float32),         # (1, Ow)
        hid_w=hid_w, mlp_w=mlp_w, out_w=out_w, glimpses=G,
        matmul_dtype=matmul_dtype,
    )


def _vmem_limit_bytes():
    try:
        cap = pltpu.get_tpu_info().vmem_capacity_bytes
    except Exception:
        cap = 64 * 1024 * 1024          # v7x-safe fallback
    # Leave headroom below physical VMEM (v7x: 64 MiB -> 48; v5e/v6e: 128 -> 96).
    return int(min(cap * 3 // 4, 96 * 1024 * 1024))


def _pick_tile_b(B, S, Hw, Mw, G, Ow, itemsize, vmem_limit):
    """Largest batch tile (multiple of 8) whose double-buffered tiles plus f32
    intermediates fit comfortably inside the scoped-VMEM limit."""
    weights = (Hw * Mw + Mw + Mw * G + G + G * Hw * Ow + Ow) * itemsize
    per_row = (2 * (S * Hw + S + Ow)) * itemsize \
              + (S * Mw + 2 * G * S + G * Hw + Ow) * 4
    budget = max(vmem_limit // 2 - 2 * weights, per_row * 8)
    tb = max(8, (budget // per_row) // 8 * 8)
    return int(min(B, tb))


def slimmable_attflat(x, x_mask, slim, *, tile_b=None):
    """x: (B, S, int(HIDDEN*width)); x_mask: (B, 1, 1, S) bool (True = padded)."""
    B, S, Hw = x.shape
    G, Mw, Ow = slim["glimpses"], slim["mlp_w"], slim["out_w"]
    assert Hw == slim["hid_w"] and slim["mrg_w"].shape == (G * Hw, Ow)
    dt = slim["matmul_dtype"]

    # Additive mask bias: 0 valid / -1e9 masked.  Identical to masked_fill(-1e9)
    # for every row with >=1 unmasked position (masked logits underflow to 0
    # after the softmax either way).
    mask = jnp.squeeze(x_mask, axis=(1, 2))
    bias = jnp.where(mask, -1.0e9, 0.0).astype(jnp.float32)      # (B, S)

    vmem_limit = _vmem_limit_bytes()
    if tile_b is None:
        tile_b = _pick_tile_b(B, S, Hw, Mw, G, Ow,
                              jnp.dtype(dt).itemsize, vmem_limit)
    tb = int(tile_b)

    def resident(shape):
        return pl.BlockSpec(shape, lambda b, _s=shape: tuple(0 for _ in _s))

    out = pl.pallas_call(
        attflat_kernel,
        out_shape=jax.ShapeDtypeStruct((B, Ow), jnp.float32),
        grid=(pl.cdiv(B, tb),),
        in_specs=[
            pl.BlockSpec((tb, S, Hw), lambda b: (b, 0, 0)),      # x tile
            pl.BlockSpec((tb, S), lambda b: (b, 0)),             # mask bias tile
            resident(slim["fc_w"].shape),
            resident(slim["fc_b"].shape),
            resident(slim["lin_w"].shape),
            resident(slim["lin_b"].shape),
            resident(slim["mrg_w"].shape),
            resident(slim["mrg_b"].shape),
        ],
        out_specs=pl.BlockSpec((tb, Ow), lambda b: (b, 0)),
        compiler_params=pltpu.CompilerParams(
            dimension_semantics=("parallel",),
            vmem_limit_bytes=vmem_limit,
        ),
    )(x.astype(dt), bias, slim["fc_w"], slim["fc_b"], slim["lin_w"],
      slim["lin_b"], slim["mrg_w"], slim["mrg_b"])
    return out


# --------------------------- pure-JAX reference -------------------------------
def reference_attflat(x, x_mask, params, width, C):
    hid_w = int(C["HIDDEN_SIZE"] * width)
    mlp_w = int(C["FLAT_MLP_SIZE"] * width)
    out_w = int(C["FLAT_OUT_SIZE"] * width)
    merge_in_w = int(C["HIDDEN_SIZE"] * C["FLAT_GLIMPSES"] * width)
    G = C["FLAT_GLIMPSES"]

    h = jnp.maximum(x @ params["fc_w"][:mlp_w, :hid_w].T + params["fc_b"][:mlp_w], 0.0)
    att = h @ params["lin_w"][:, :mlp_w].T + params["lin_b"]            # (B,S,G)
    mask = jnp.squeeze(x_mask, axis=(1, 2))[:, :, None]                 # (B,S,1) bool
    att = jnp.where(mask, -1000000000.0, att)
    att = jax.nn.softmax(att, axis=1)
    att_list = [jnp.sum(att[:, :, i:i + 1] * x, axis=1) for i in range(G)]
    x_atted = jnp.concatenate(att_list, axis=1)
    return x_atted @ params["mrg_w"][:out_w, :merge_in_w].T + params["mrg_b"][:out_w]


# ---------------------------------- main --------------------------------------
if __name__ == "__main__":
    C = dict(HIDDEN_SIZE=32, FLAT_MLP_SIZE=64, FLAT_GLIMPSES=2,
             FLAT_OUT_SIZE=128, DROPOUT_R=0.1)
    width = 0.5
    B, S = 2, 8
    hid_w = int(C["HIDDEN_SIZE"] * width)   # 16

    key = jax.random.PRNGKey(0)
    ks = jax.random.split(key, 8)

    # Deterministic synthetic parameters (full, un-slimmed shapes from __init__).
    params = {
        "fc_w":  0.1 * jax.random.normal(ks[0], (C["FLAT_MLP_SIZE"], C["HIDDEN_SIZE"]), jnp.float32),
        "fc_b":  0.1 * jax.random.normal(ks[1], (C["FLAT_MLP_SIZE"],), jnp.float32),
        "lin_w": 0.1 * jax.random.normal(ks[2], (C["FLAT_GLIMPSES"], C["FLAT_MLP_SIZE"]), jnp.float32),
        "lin_b": 0.1 * jax.random.normal(ks[3], (C["FLAT_GLIMPSES"],), jnp.float32),
        "mrg_w": 0.1 * jax.random.normal(ks[4], (C["FLAT_OUT_SIZE"],
                                                 C["HIDDEN_SIZE"] * C["FLAT_GLIMPSES"]), jnp.float32),
        "mrg_b": 0.1 * jax.random.normal(ks[5], (C["FLAT_OUT_SIZE"],), jnp.float32),
    }

    x = jax.random.normal(ks[6], (B, S, hid_w), jnp.float32)
    # torch-style mask: (B, 1, 1, S) bool, True = padded position
    seq_lens = jnp.array([6, 4], dtype=jnp.int32)
    x_mask = (jnp.arange(S)[None, :] >= seq_lens[:, None]).reshape(B, 1, 1, S)

    # Demo uses f32 matmul operands for a tight check; pass
    # matmul_dtype=jnp.bfloat16 in production to halve HBM traffic / VMEM use.
    slim = prepare_slim_params(params, width, C, matmul_dtype=jnp.float32)
    out = slimmable_attflat(x, x_mask, slim)
    out = jax.block_until_ready(out)

    ref = reference_attflat(x, x_mask, params, width, C)
    assert out.shape == (B, int(C["FLAT_OUT_SIZE"] * width))
    # Tolerance accounts for pl.reciprocal(approx=True) in the softmax denom.
    assert jnp.allclose(out, ref, atol=1e-3, rtol=1e-3), "mismatch vs reference"

    print("KERNEL_OK")
</pallas_src>

<mosaic_0001>
module attributes {stable_mosaic.version = 11 : i64} {
  func.func @attflat_kernel(%arg0: i32, %arg1: memref<2x8x16xf32, #tpu.memory_space<vmem>>, %arg2: memref<2x8xf32, #tpu.memory_space<vmem>>, %arg3: memref<16x32xf32, #tpu.memory_space<vmem>>, %arg4: memref<1x32xf32, #tpu.memory_space<vmem>>, %arg5: memref<32x2xf32, #tpu.memory_space<vmem>>, %arg6: memref<2x1xf32, #tpu.memory_space<vmem>>, %arg7: memref<32x64xf32, #tpu.memory_space<vmem>>, %arg8: memref<1x64xf32, #tpu.memory_space<vmem>>, %arg9: memref<2x64xf32, #tpu.memory_space<vmem>>) attributes {dimension_semantics = [#tpu.dimension_semantics<parallel>], iteration_bounds = array<i64: 1>, scalar_prefetch = 0 : i64, scratch_operands = 0 : i64, tpu.core_type = #tpu.core_type<tc>, window_params = [{transform_indices = @transform_0, window_bounds = array<i64: 2, 8, 16>}, {transform_indices = @transform_1, window_bounds = array<i64: 2, 8>}, {pipeline_mode = #tpu.pipeline_mode<synchronous>, transform_indices = @transform_2, window_bounds = array<i64: 16, 32>}, {pipeline_mode = #tpu.pipeline_mode<synchronous>, transform_indices = @transform_3, window_bounds = array<i64: 1, 32>}, {pipeline_mode = #tpu.pipeline_mode<synchronous>, transform_indices = @transform_4, window_bounds = array<i64: 32, 2>}, {pipeline_mode = #tpu.pipeline_mode<synchronous>, transform_indices = @transform_5, window_bounds = array<i64: 2, 1>}, {pipeline_mode = #tpu.pipeline_mode<synchronous>, transform_indices = @transform_6, window_bounds = array<i64: 32, 64>}, {pipeline_mode = #tpu.pipeline_mode<synchronous>, transform_indices = @transform_7, window_bounds = array<i64: 1, 64>}, {transform_indices = @transform_8, window_bounds = array<i64: 2, 64>}]} {
    %c0 = arith.constant 0 : index
    %c0_0 = arith.constant 0 : index
    %c0_1 = arith.constant 0 : index
    %0 = vector.load %arg1[%c0, %c0_0, %c0_1] : memref<2x8x16xf32, #tpu.memory_space<vmem>>, vector<2x8x16xf32>
    %c0_2 = arith.constant 0 : index
    %c0_3 = arith.constant 0 : index
    %1 = vector.load %arg3[%c0_2, %c0_3] : memref<16x32xf32, #tpu.memory_space<vmem>>, vector<16x32xf32>
    "tpu.trace_start"() <{level = 10 : i32, message = "bsh,hm->bsm"}> : () -> ()
    %cst = arith.constant dense<0.000000e+00> : vector<2x8x32xf32>
    %2 = tpu.matmul %0, %1, %cst {dimension_numbers = #tpu.dot_dimension_numbers<[2], [0], [0, 1], [1], [0, 0, 0, 1, 1, 1], [], []>} : vector<2x8x16xf32>, vector<16x32xf32>, vector<2x8x32xf32> -> vector<2x8x32xf32>
    "tpu.trace_stop"() : () -> ()
    %c0_4 = arith.constant 0 : index
    %c0_5 = arith.constant 0 : index
    %3 = vector.load %arg4[%c0_4, %c0_5] : memref<1x32xf32, #tpu.memory_space<vmem>>, vector<1x32xf32>
    %4 = vector.shape_cast %3 : vector<1x32xf32> to vector<1x1x32xf32>
    %5 = vector.broadcast %4 : vector<1x1x32xf32> to vector<2x8x32xf32>
    %6 = arith.addf %2, %5 : vector<2x8x32xf32>
    %cst_6 = arith.constant 0.000000e+00 : f32
    %7 = vector.broadcast %cst_6 : f32 to vector<2x8x32xf32>
    %8 = arith.maximumf %6, %7 : vector<2x8x32xf32>
    %c0_7 = arith.constant 0 : index
    %c0_8 = arith.constant 0 : index
    %9 = vector.load %arg5[%c0_7, %c0_8] : memref<32x2xf32, #tpu.memory_space<vmem>>, vector<32x2xf32>
    "tpu.trace_start"() <{level = 10 : i32, message = "bsm,mg->bgs"}> : () -> ()
    %cst_9 = arith.constant dense<0.000000e+00> : vector<2x2x8xf32>
    %10 = tpu.matmul %9, %8, %cst_9 {dimension_numbers = #tpu.dot_dimension_numbers<[0], [2], [1], [0, 1], [0, 1, 1, 0, 1, 1], [], []>} : vector<32x2xf32>, vector<2x8x32xf32>, vector<2x2x8xf32> -> vector<2x2x8xf32>
    %11 = tpu.transpose %10, [1, 0, 2] : vector<2x2x8xf32> -> vector<2x2x8xf32>
    "tpu.trace_stop"() : () -> ()
    %c0_10 = arith.constant 0 : index
    %c0_11 = arith.constant 0 : index
    %12 = vector.load %arg6[%c0_10, %c0_11] : memref<2x1xf32, #tpu.memory_space<vmem>>, vector<2x1xf32>
    %13 = vector.shape_cast %12 : vector<2x1xf32> to vector<1x2x1xf32>
    %14 = vector.broadcast %13 : vector<1x2x1xf32> to vector<2x2x8xf32>
    %15 = arith.addf %11, %14 : vector<2x2x8xf32>
    %c0_12 = arith.constant 0 : index
    %c0_13 = arith.constant 0 : index
    %16 = vector.load %arg2[%c0_12, %c0_13] : memref<2x8xf32, #tpu.memory_space<vmem>>, vector<2x8xf32>
    %17 = vector.shape_cast %16 : vector<2x8xf32> to vector<2x1x8xf32>
    %18 = vector.broadcast %17 : vector<2x1x8xf32> to vector<2x2x8xf32>
    %19 = arith.addf %15, %18 : vector<2x2x8xf32>
    %cst_14 = arith.constant dense<0xFF800000> : vector<2x2xf32>
    %20 = vector.multi_reduction <maximumf>, %19, %cst_14 [2] : vector<2x2x8xf32> to vector<2x2xf32>
    %21 = vector.shape_cast %20 : vector<2x2xf32> to vector<2x2x1xf32>
    %22 = vector.broadcast %21 : vector<2x2x1xf32> to vector<2x2x8xf32>
    %23 = arith.subf %19, %22 : vector<2x2x8xf32>
    %24 = math.exp %23 : vector<2x2x8xf32>
    %cst_15 = arith.constant dense<0.000000e+00> : vector<2x2xf32>
    %25 = vector.multi_reduction <add>, %24, %cst_15 [2] : vector<2x2x8xf32> to vector<2x2xf32>
    %26 = vector.shape_cast %25 : vector<2x2xf32> to vector<2x2x1xf32>
    %27 = tpu.reciprocal %26 {approx = true} : vector<2x2x1xf32> -> vector<2x2x1xf32>
    %28 = vector.broadcast %27 : vector<2x2x1xf32> to vector<2x2x8xf32>
    %29 = arith.mulf %24, %28 : vector<2x2x8xf32>
    "tpu.trace_start"() <{level = 10 : i32, message = "bgs,bsh->bgh"}> : () -> ()
    %cst_16 = arith.constant dense<0.000000e+00> : vector<2x2x16xf32>
    %30 = tpu.matmul %29, %0, %cst_16 {dimension_numbers = #tpu.dot_dimension_numbers<[2], [1], [1], [2], [0, 0, 0, 1, 1, 2], [0], [0]>} : vector<2x2x8xf32>, vector<2x8x16xf32>, vector<2x2x16xf32> -> vector<2x2x16xf32>
    "tpu.trace_stop"() : () -> ()
    %31 = vector.shape_cast %30 : vector<2x2x16xf32> to vector<2x32xf32>
    %c0_17 = arith.constant 0 : index
    %c0_18 = arith.constant 0 : index
    %32 = vector.load %arg7[%c0_17, %c0_18] : memref<32x64xf32, #tpu.memory_space<vmem>>, vector<32x64xf32>
    %cst_19 = arith.constant dense<0.000000e+00> : vector<2x64xf32>
    %33 = tpu.matmul %31, %32, %cst_19 {dimension_numbers = #tpu.dot_dimension_numbers<[1], [0], [0], [1], [0, 0, 1, 1], [], []>} : vector<2x32xf32>, vector<32x64xf32>, vector<2x64xf32> -> vector<2x64xf32>
    %c0_20 = arith.constant 0 : index
    %c0_21 = arith.constant 0 : index
    %34 = vector.load %arg8[%c0_20, %c0_21] : memref<1x64xf32, #tpu.memory_space<vmem>>, vector<1x64xf32>
    %35 = vector.broadcast %34 : vector<1x64xf32> to vector<2x64xf32>
    %36 = arith.addf %33, %35 : vector<2x64xf32>
    %c0_22 = arith.constant 0 : index
    %c0_23 = arith.constant 0 : index
    %37 = vector.load %arg9[%c0_22, %c0_23] : memref<2x64xf32, #tpu.memory_space<vmem>>, vector<2x64xf32>
    tpu.vector_store %arg9[%c0_22, %c0_23], %36 {strides = array<i32>} : memref<2x64xf32, #tpu.memory_space<vmem>>, vector<2x64xf32>,
    return
  }
  func.func @transform_0(%arg0: i32) -> (i32, i32, i32) {
    %c0_i32 = arith.constant 0 : i32
    %c0_i32_0 = arith.constant 0 : i32
    %c0_i32_1 = arith.constant 0 : i32
    return %arg0, %c0_i32, %c0_i32_0 : i32, i32, i32
  }
  func.func @transform_1(%arg0: i32) -> (i32, i32) {
    %c0_i32 = arith.constant 0 : i32
    %c0_i32_0 = arith.constant 0 : i32
    return %arg0, %c0_i32 : i32, i32
  }
  func.func @transform_2(%arg0: i32) -> (i32, i32) {
    %c0_i32 = arith.constant 0 : i32
    %c0_i32_0 = arith.constant 0 : i32
    %c0_i32_1 = arith.constant 0 : i32
    return %c0_i32, %c0_i32_0 : i32, i32
  }
  func.func @transform_3(%arg0: i32) -> (i32, i32) {
    %c0_i32 = arith.constant 0 : i32
    %c0_i32_0 = arith.constant 0 : i32
    %c0_i32_1 = arith.constant 0 : i32
    return %c0_i32, %c0_i32_0 : i32, i32
  }
  func.func @transform_4(%arg0: i32) -> (i32, i32) {
    %c0_i32 = arith.constant 0 : i32
    %c0_i32_0 = arith.constant 0 : i32
    %c0_i32_1 = arith.constant 0 : i32
    return %c0_i32, %c0_i32_0 : i32, i32
  }
  func.func @transform_5(%arg0: i32) -> (i32, i32) {
    %c0_i32 = arith.constant 0 : i32
    %c0_i32_0 = arith.constant 0 : i32
    %c0_i32_1 = arith.constant 0 : i32
    return %c0_i32, %c0_i32_0 : i32, i32
  }
  func.func @transform_6(%arg0: i32) -> (i32, i32) {
    %c0_i32 = arith.constant 0 : i32
    %c0_i32_0 = arith.constant 0 : i32
    %c0_i32_1 = arith.constant 0 : i32
    return %c0_i32, %c0_i32_0 : i32, i32
  }
  func.func @transform_7(%arg0: i32) -> (i32, i32) {
    %c0_i32 = arith.constant 0 : i32
    %c0_i32_0 = arith.constant 0 : i32
    %c0_i32_1 = arith.constant 0 : i32
    return %c0_i32, %c0_i32_0 : i32, i32
  }
  func.func @transform_8(%arg0: i32) -> (i32, i32) {
    %c0_i32 = arith.constant 0 : i32
    %c0_i32_0 = arith.constant 0 : i32
    return %arg0, %c0_i32 : i32, i32
  }
}

</mosaic_0001>

<bundles_post_ra>
// kernel: tpu_custom_call.1
= control target key start
LH: loop header
LB: loop body
LE: loop exit
PB: predicated region body
PF: predicated region fallthrough
CT: control target
= control target key end

     0   :  { %13 = vsyncpa [#allocation3], 0  ;;  %s590_s0 = inlined_call_operand.hbm [shape: f32[2,8,16], index: 0, kind: input, shape index: {}]   ;;  %s591_s1 = inlined_call_operand.vmem [shape: f32[2,8], index: 1, kind: input, shape index: {}]   ;;  %s592_s2 = inlined_call_operand.hbm [shape: f32[16,32], index: 2, kind: input, shape index: {}]   ;;  %s593_s3 = inlined_call_operand.vmem [shape: f32[1,32], index: 3, kind: input, shape index: {}]   ;;  %s594_s4 = inlined_call_operand.vmem [shape: f32[32,2], index: 4, kind: input, shape index: {}]   ;;  %s595_s5 = inlined_call_operand.vmem [shape: f32[2,1], index: 5, kind: input, shape index: {}]   ;;  %s596_s6 = inlined_call_operand.vmem [shape: f32[32,64], index: 6, kind: input, shape index: {}]   ;;  %s597_s7 = inlined_call_operand.vmem [shape: f32[1,64], index: 7, kind: input, shape index: {}]   ;;  %s598_s8 = inlined_call_operand.hbm [shape: f32[2,64], index: 8, kind: output, shape index: {}]  }
   0x1   :  { %14 = vsyncpa [#allocation6], 0 }
   0x2   :  { %15 = vsyncpa [#allocation4], 0  ;;  %s20_s29 = sshll.u32 %s590_s0, 4  ;;  %s460_s30 = smov [#allocation2]   ;;  %s21_s29 = int_to_ptr.hbm [resolvable:$true] %s20_s29 }
   0x3   :  { %s22_s9 = sshll.u32 %s460_s30, 4  ;;  %s35_s12 = sshll.u32 %s592_s2, 4  ;;  %s23_s9 = int_to_ptr.vmem [resolvable:$true] %s22_s9  ;;  %s36_s12 = int_to_ptr.hbm [resolvable:$true] %s35_s12 }
   0x4   :  { %s461_s13 = smov 128   ;;  %s462_s14 = smov 8  }
   0x5   :  { %28 = dma.hbm_to_vmem [thread:$0]  %s21_s29, 256, %s23_s9, [#allocation3], %s461_s13, %s461_s13, %s462_s14  }
   0x6   :  { %s463_s15 = smov [#allocation5]  }
   0x7   :  { %s37_s16 = sshll.u32 %s463_s15, 4  ;;  %s38_s16 = int_to_ptr.vmem [resolvable:$true] %s37_s16 }
   0x8   :  { %43 = dma.hbm_to_vmem [thread:$0]  %s36_s12, 256, %s38_s16, [#allocation6], %s461_s13, %s461_s13, %s462_s14  }
   0x9   :  { %454 = dma.done.wait [#allocation3], 256  }
   0xa   :  { %455 = vsyncadd [#allocation3], 4294967040 }
   0xb   :  { %456 = dma.done.wait [#allocation6], 256  }
   0xc   :  { %457 = vsyncadd [#allocation6], 4294967040  ;;  %v102_v0 = vld [vmem:[%s594_s4] sm:$0xff]  ;;  %v65_v1 = vld [vmem:[#allocation5 + $0x8] sm:$0xff]  ;;  %vm70_vm0 = vcmask 130048   ;;  %vm152_vm1 = vcmask 261120  }
   0xd   :  { %v64_v2 = vld [vmem:[#allocation5] sm:$0xff]  ;;  %120 = vxpose.xlu0.b32.start [1/4] (short) (narrow) %v102_v0, 8  ;;  %91 = vmatpush.msra.mxu0 %v65_v1  ;;  %v62_v3 = vld [vmem:[#allocation2] sm:$0xff]  ;;  %v63_v4 = vld [vmem:[#allocation2 + $0x8] sm:$0xff]  ;;  %v464_v10 = vmov 1934713408  }
   0xe   :  { %260 = vmatpush.msra.mxu2 %v62_v3  ;;  %283 = vmatpush.msra.mxu3 %v63_v4  ;;  %v103_v5 = vld [vmem:[%s594_s4 + $0x8] sm:$0xff]  ;;  %v104_v6 = vld [vmem:[%s594_s4 + $0x10] sm:$0xff]  ;;  %v105_v7 = vld [vmem:[%s594_s4 + $0x18] sm:$0xff]  ;;  %v109_v11 = vunpack.c.l.s4 %v464_v10  ;;  %v465_v16 = vmov 0.0   ;;  %vm106_vm2 = vcmask 1047556   ;;  %v466_v24 = vmov 0  }
   0xf   :  { %92 = vmatpush.msra.mxu0 %v64_v2  ;;  %v372_v9 = vld [vmem:[%s593_s3] ss:$0 sm:$0xff]  ;;  %370 = vset.pattern.permute.xlu2 %v466_v24  ;;  %vm118_vm3 = vcmask 64512   ;;  %s467_s25 = smov 120   ;;  %vm219_vm4 = vcmask 58368   ;;  %s468_s12 = smov 16  }
  0x10   :  { %352 = vmatmul.msk.f32.vlgmr.msra.gmra.mxu0 %vm70_vm0, %v62_v3  ;;  %v540_v13 = vunpack.c.0.s8 %v109_v11  ;;  %v202_v23 = vld [vmem:[%s595_s5] sm:$0x3]  ;;  %v304_v3 = vld [vmem:[%s596_s6 + $0x18] sm:$0xff]  ;;  %s341_s17 = sshll.u32 %s598_s8, 4  ;;  %vm332_vm5 = vcmask 517120   ;;  %s342_s17 = int_to_ptr.hbm [resolvable:$true] %s341_s17 }
  0x11   :  { %205 = vperm.xlu2 %370, %v202_v23   ;;  %v210_v35 = vld [vmem:[%s591_s1] sm:$0x3]  ;;  %324 = vmatpush.msrb.mxu2 %v304_v3 }
  0x12   :  { %v111_v17 = vperm.slane %v465_v16, %v540_v13  ;;  %v212_v39 = vrot.slane %v210_v35, 1  ;;  %v213_v41 = vperm.slane %v210_v35, 0 }
  0x14   :  { %v112_v19 = vrot.slane %v111_v17, 4  ;;  %v214_v44 = vperm.slane %v212_v39, 0 }
  0x15   :  { %121 = vxpose.xlu0.b32.cont [2/4] (short) (narrow) %v103_v5, 8  ;;  %v302_v5 = vld [vmem:[%s596_s6 + $0x8] sm:$0xff] }
  0x16   :  { %v113_v21 = vsel %vm106_vm2, 0.0, %v112_v19 }
  0x17   :  { %115 = vrot.lane.b32.xlu1 %v113_v21, %s462_s14  ;;  %s469_s14 = smov [#allocation7]  }
  0x18   :  { %353 = vmatmul.msk.f32.gmra.mxu0 %vm70_vm0, %v63_v4  ;;  %v303_v4 = vld [vmem:[%s596_s6 + $0x10] sm:$0xff]  ;;  %s339_s15 = sshll.u32 %s469_s14, 4  ;;  %s340_s15 = int_to_ptr.vmem [resolvable:$true] %s339_s15 }
  0x19   :  { %325 = vmatpush.msrb.mxu2 %v303_v4 }
  0x1b   :  { %326 = vmatpush.msrb.mxu2 %v302_v5 }
  0x1d   :  { %122 = vxpose.xlu0.b32.cont [3/4] (short) (narrow) %v104_v6, 8  ;;  %v301_v6 = vld [vmem:[%s596_s6] sm:$0xff] }
  0x1e   :  { %327 = vmatpush.msrb.mxu2 %v301_v6 }
  0x25   :  { %123 = vxpose.xlu0.b32.end [4/4] (short) (narrow) %v105_v7, 8 }
  0x6b   :  { %v206_v37 = vpop.permute.xlu2 %205 }
  0x89   :  { %v116_v25 = vpop.permute.xlu1 %115 }
  0x8a   :  { %v119_v26 = vsel %vm118_vm3, %v111_v17, %v116_v25  ;;  %v373_v17 = vld [vmem:[%s597_s7] ss:$0 sm:$0xff] }
  0x8c   :  { %371 = vset.pattern.permute.xlu0 %v466_v24 }
  0x8d   :  { %v94_v8 = vpop.f32.mrf.mxu0 }
  0x8e   :  { %v95_v14 = vadd.f32 %v372_v9, %v94_v8 }
  0x90   :  { %v100_v20 = vmax.f32 %v95_v14, 0.0 }
  0x95   :  { %v97_v12 = vpop.f32.mrf.mxu0 }
  0x96   :  { %v98_v15 = vadd.f32 %v372_v9, %v97_v12 }
  0x98   :  { %v101_v18 = vmax.f32 %v98_v15, 0.0 }
  0x9a   :  { %354 = vmatpush.xpose.msk.msra.mxu1 %vm152_vm1, %v101_v18 }
  0x9e   :  { %355 = vmatpush.xpose.msk.msra.mxu1 %vm152_vm1, %v100_v20 }
  0xb1   :  { %v136_v22 = vpop.trf.xlu0 }
  0xb2   :  { %356 = vmatmul.msk.f32.vlgmr.msra.gmra.mxu1 %vm152_vm1, %v136_v22 }
 0x12f   :  { %v179_v27 = vpop.f32.mrf.mxu1 }
 0x130   :  { %v180_v28 = vadd.f32 %v179_v27, %v119_v26 }
 0x132   :  { %183 = vrot.lane.b32.xlu1 %v180_v28, %s467_s25 }
 0x1a4   :  { %v184_v29 = vpop.permute.xlu1 %183 }
 0x1a5   :  { %v186_v30 = vrot.slane %v184_v29, 4 }
 0x1a7   :  { %v187_v31 = vsel %vm106_vm2, %v186_v30, %v180_v28 }
 0x1a8   :  { %v191_v32 = vperm.slane %v187_v31, %v540_v13 }
 0x1aa   :  { %v192_v33 = vrot.slane %v191_v32, 4 }
 0x1ac   :  { %v193_v34 = vsel %vm106_vm2, 0.0, %v192_v33 }
 0x1ad   :  { %v194_v36 = vrot.slane %v193_v34, 4 }
 0x1af   :  { %v195_v38 = vsel %vm106_vm2, %v194_v36, %v191_v32 }
 0x1b0   :  { %v199_v40 = vperm.slane %v195_v38, %v540_v13 }
 0x1b2   :  { %v200_v42 = vrot.slane %v199_v40, 4  ;;  %v208_v43 = vadd.f32 %v206_v37, %v199_v40 }
 0x1b4   :  { %v201_v45 = vsel %vm106_vm2, 0.0, %v200_v42  ;;  %v217_v46 = vadd.f32 %v213_v41, %v208_v43 }
 0x1b5   :  { %v209_v47 = vadd.f32 %v206_v37, %v201_v45 }
 0x1b6   :  { %v220_v48 = vsel %vm219_vm4, %v217_v46, -inf }
 0x1b7   :  { %221 = vmax.xlane.f32.xlu1 %v220_v48  ;;  %v218_v49 = vadd.f32 %v214_v44, %v209_v47 }
 0x1b9   :  { %v223_v50 = vsel %vm219_vm4, %v218_v49, -inf }
 0x1ba   :  { %224 = vmax.xlane.f32.xlu2 %v223_v50 }
 0x22a   :  { %v222_v51 = vpop.xlane.xlu1 %221 }
 0x22b   :  { %v226_v52 = vsub.f32 %v217_v46, %v222_v51 }
 0x22d   :  { %v228_v53 = vmul.f32 1.442695, %v226_v52  ;;  %v225_v54 = vpop.xlane.xlu2 %224 }
 0x22e   :  { %v227_v55 = vsub.f32 %v218_v49, %v225_v54 }
 0x22f   :  { %374 = vpow2.f32 %v228_v53 }
 0x230   :  { %v230_v56 = vmul.f32 1.442695, %v227_v55 }
 0x232   :  { %376 = vpow2.f32 %v230_v56 }
 0x235   :  { %v375_v57 = vpop.eup %374 }
 0x236   :  { %v232_v58 = vsel %vm219_vm4, %v375_v57, 0.0 }
 0x237   :  { %233 = vadd.xlane.f32.xlu2 %v232_v58 }
 0x238   :  { %v377_v59 = vpop.eup %376 }
 0x239   :  { %v235_v60 = vsel %vm219_vm4, %v377_v59, 0.0 }
 0x23a   :  { %236 = vadd.xlane.f32.xlu0 %v235_v60 }
 0x2aa   :  { %v234_v61 = vpop.xlane.xlu2 %233 }
 0x2ab   :  { %378 = vrcp.f32 %v234_v61 }
 0x2ad   :  { %v237_v62 = vpop.xlane.xlu0 %236 }
 0x2ae   :  { %380 = vrcp.f32 %v237_v62 }
 0x2b1   :  { %v379_v63 = vpop.eup %378 }
 0x2b2   :  { %v240_v0 = vmul.f32 %v379_v63, %v375_v57 }
 0x2b4   :  { %v381_v1 = vpop.eup %380  ;;  %357 = vmatmul.msk.f32.vlgmr.msra.gmra.mxu2 %vm118_vm3, %v240_v0 }
 0x2b5   :  { %v241_v2 = vmul.f32 %v381_v1, %v377_v59 }
 0x2b7   :  { %358 = vmatmul.msk.f32.vlgmr.msra.gmra.mxu3 %vm118_vm3, %v241_v2 }
 0x337   :  { %v262_v9 = vpop.f32.mrf.mxu2 }
 0x33a   :  { %v285_v7 = vpop.f32.mrf.mxu3 }
 0x33b   :  { %v288_v8 = vrot.slane %v285_v7, 4 }
 0x33d   :  { %v289_v10 = vsel %vm106_vm2, %v288_v8, %v262_v9 }
 0x33e   :  { %v293_v11 = vperm.slane %v289_v10, %v540_v13 }
 0x340   :  { %v294_v12 = vrot.slane %v293_v11, 4 }
 0x342   :  { %v295_v14 = vsel %vm106_vm2, 0.0, %v294_v12 }
 0x343   :  { %297 = vrot.lane.b32.xlu2 %v295_v14, %s468_s12 }
 0x39d   :  { %v298_v15 = vpop.permute.xlu2 %297 }
 0x39e   :  { %v300_v16 = vsel %vm70_vm0, %v293_v11, %v298_v15 }
 0x39f   :  { %359 = vmatmul.msk.f32.vlgmr.msrb.gmra.mxu2 %vm152_vm1, %v300_v16 }
 0x422   :  { %v329_v13 = vpop.f32.mrf.mxu2 }
 0x423   :  { %v330_v18 = vadd.f32 %v373_v17, %v329_v13 }
 0x425   :  { %333 = vst.msk [vmem:[#allocation7] sm:$0x3] %vm332_vm5, %v330_v18 }
 0x426   :  { %344 = dma.vmem_to_hbm [thread:$0]  %s340_s15, 32, %s342_s17, [#allocation4]  }
 0x427   :  { %458 = dma.done.wait [#allocation4], 32  }
 0x428   :  { %459 = vsyncadd [#allocation4], 4294967264 }
 0x429   :  { %349 = vsyncpa [#allocation3], 1 }
 0x42a   :  { %350 = vsyncpa [#allocation6], 1 }
 0x42b   :  { %351 = vsyncpa [#allocation4], 1 }

</bundles_post_ra>
